<compile_context>
chip_gen: v6e
topology: v6e:2x2x1
jax: 0.10.0
libtpu: 0.0.40
codegen_flags: <defaults>
</compile_context>

<pallas_src>
import jax
import jax.numpy as jnp
from jax.experimental import pallas as pl
from jax.experimental.pallas import tpu as pltpu


def _round_up(n, m):
    return ((n + m - 1) // m) * m


def _vmem_capacity_bytes():
    try:
        return int(pltpu.get_tpu_info().vmem_capacity_bytes)
    except Exception:
        return 64 * 1024 * 1024  # conservative default (v7x per-TC VMEM)


def _mlp_kernel(x_ref, w1_ref, b1_ref, w2_ref, b2_ref, o_ref):
    # hidden1: x @ W1 on the MXU with f32 accumulation (operands may be bf16).
    h = jnp.dot(x_ref[...], w1_ref[...], preferred_element_type=jnp.float32)
    # Bias add + ReLU in f32 on the VPU (biases are kept f32 even in bf16 mode).
    h = jnp.maximum(h + b1_ref[...], 0.0)
    # hOutput1: cast activations to the weight dtype (no-op in f32 mode) + matmul.
    out = jnp.dot(h.astype(w2_ref.dtype), w2_ref[...],
                  preferred_element_type=jnp.float32)
    o_ref[...] = (out + b2_ref[...]).astype(o_ref.dtype)


def mlp_reference(x, w1, b1, w2, b2):
    """Plain-XLA forward (exact module semantics, full-f32 matmuls)."""
    p = jax.lax.Precision.HIGHEST
    h = jnp.maximum(jnp.dot(x, w1, precision=p) + b1.reshape(1, -1), 0.0)
    return jnp.dot(h, w2, precision=p) + b2.reshape(1, -1)


def make_simple_general_neural_net(w1, b1, w2, b2, *, block_m=512,
                                   matmul_dtype=jnp.bfloat16, out_dtype=None):
    """Builds a jitted forward fn for SimpleGeneralNeuralNet.

    w1: (D, H)   b1: (H,) or (1, H)   w2: (H, C)   b2: (C,) or (1, C)
    Weights are stored pre-transposed to (in_features, out_features) so the kernel
    computes x @ W + b (== PyTorch Linear's x @ W.T + b).

    All weight padding / casting happens ONCE here, not per forward call.
    """
    D, H = w1.shape
    C = w2.shape[1]

    # Lane/sublane-dense feature dims: pad D, H, C to multiples of 128, once.
    # Zero padding is exact: padded x columns hit zero W1 rows, padded hidden units
    # get bias 0 -> relu(0)=0 -> hit zero W2 rows, padded output columns are sliced.
    D_pad = _round_up(D, 128)
    H_pad = _round_up(H, 128)
    C_pad = _round_up(C, 128)

    w1p = jnp.pad(w1, ((0, D_pad - D), (0, H_pad - H)))
    b1p = jnp.pad(b1.reshape(1, -1), ((0, 0), (0, H_pad - H)))
    w2p = jnp.pad(w2, ((0, H_pad - H), (0, C_pad - C)))
    b2p = jnp.pad(b2.reshape(1, -1), ((0, 0), (0, C_pad - C)))

    if matmul_dtype is not None:
        w1p = w1p.astype(matmul_dtype)
        w2p = w2p.astype(matmul_dtype)
    # Biases stay f32 for the VPU epilogue (v5e has no bf16 VPU path).
    b1p = b1p.astype(jnp.float32)
    b2p = b2p.astype(jnp.float32)
    w1p, b1p, w2p, b2p = jax.device_put((w1p, b1p, w2p, b2p))

    w_item = jnp.dtype(w1p.dtype).itemsize
    weight_bytes = (w1p.size + w2p.size) * w_item + (b1p.size + b2p.size) * 4

    # Generation-aware VMEM budget (~75% of physical: 48 MiB v7x, 96 MiB v5e/v6e).
    vmem_budget = min(int(0.75 * _vmem_capacity_bytes()), 100 * 1024 * 1024)

    # VMEM-resident weight design only works if the weights actually fit.
    use_pallas = weight_bytes <= 0.5 * vmem_budget

    def forward(x):
        B, Din = x.shape
        assert Din == D, f"expected input size {D}, got {Din}"
        od = out_dtype if out_dtype is not None else x.dtype

        if not use_pallas:
            # XLA fallback for weights too large to keep VMEM-resident (v7x 64 MiB).
            h = jnp.maximum(jnp.dot(x, w1) + b1.reshape(1, -1), 0.0)
            return (jnp.dot(h, w2) + b2.reshape(1, -1)).astype(od)

        # Per-call activation prep (cheap under jit): pad D, cast to MXU dtype.
        if D_pad != D:
            x = jnp.pad(x, ((0, 0), (0, D_pad - D)))
        if matmul_dtype is not None:
            x = x.astype(matmul_dtype)
        x_item = jnp.dtype(x.dtype).itemsize
        out_item = jnp.dtype(od).itemsize

        # Batch tile: big (default 512) to amortize per-step overhead / saturate HBM.
        B8 = _round_up(B, 8)
        TM = max(8, (min(block_m, B8) // 8) * 8)
        # Keep >= 2 grid steps when the batch allows it, so the 'parallel' batch axis
        # can be sharded across v7x's two TensorCores.
        if B8 >= 16 and TM >= B8:
            TM = _round_up(pl.cdiv(B8, 2), 8)

        def footprint(tm):
            io = 2 * tm * D_pad * x_item + 2 * tm * C_pad * out_item  # dbl-buffered x/out
            interm = tm * (H_pad + C_pad) * 4                         # f32 h / out values
            return weight_bytes + io + interm

        while TM > 8 and footprint(TM) > vmem_budget:
            TM = max(8, ((TM // 2) // 8) * 8)

        B_pad = _round_up(B, TM)
        if B_pad != B:
            x = jnp.pad(x, ((0, B_pad - B), (0, 0)))

        flops = 2 * B_pad * (D_pad * H_pad + H_pad * C_pad)
        bytes_accessed = (B_pad * D_pad * x_item + weight_bytes
                          + B_pad * C_pad * out_item)

        resident = dict(pipeline_mode=pl.Buffered(1))  # single-buffer the weights
        out_pad = pl.pallas_call(
            _mlp_kernel,
            out_shape=jax.ShapeDtypeStruct((B_pad, C_pad), od),
            grid_spec=pltpu.PrefetchScalarGridSpec(
                num_scalar_prefetch=0,
                grid=(B_pad // TM,),
                in_specs=[
                    # x: batch-tiled, double-buffered (pipelined) across grid steps.
                    pl.BlockSpec((TM, D_pad), lambda i: (i, 0)),
                    # Weights/biases: constant index maps -> fetched once,
                    # VMEM-resident, single buffer (no wasted double-buffer VMEM).
                    pl.BlockSpec((D_pad, H_pad), lambda i: (0, 0), **resident),
                    pl.BlockSpec((1, H_pad), lambda i: (0, 0), **resident),
                    pl.BlockSpec((H_pad, C_pad), lambda i: (0, 0), **resident),
                    pl.BlockSpec((1, C_pad), lambda i: (0, 0), **resident),
                ],
                out_specs=pl.BlockSpec((TM, C_pad), lambda i: (i, 0)),
            ),
            compiler_params=pltpu.CompilerParams(
                dimension_semantics=("parallel",),   # batch steps are independent
                vmem_limit_bytes=vmem_budget,
            ),
            cost_estimate=pl.CostEstimate(
                flops=flops, transcendentals=0, bytes_accessed=bytes_accessed),
        )(x, w1p, b1p, w2p, b2p)

        return out_pad[:B, :C]

    return jax.jit(forward)


def init_params(key, input_size, hidden_size, num_classes, dtype=jnp.float32):
    """Mimics torch.nn.Linear default init: U[-1/sqrt(fan_in), +1/sqrt(fan_in)]."""
    k1, k2, k3, k4 = jax.random.split(key, 4)
    lim1 = 1.0 / (input_size ** 0.5)
    lim2 = 1.0 / (hidden_size ** 0.5)
    # Stored already transposed: (in_features, out_features).
    w1 = jax.random.uniform(k1, (input_size, hidden_size), dtype, -lim1, lim1)
    b1 = jax.random.uniform(k2, (hidden_size,), dtype, -lim1, lim1)
    w2 = jax.random.uniform(k3, (hidden_size, num_classes), dtype, -lim2, lim2)
    b2 = jax.random.uniform(k4, (num_classes,), dtype, -lim2, lim2)
    return w1, b1, w2, b2


if __name__ == "__main__":
    # Small, deliberately non-128-multiple shapes exercising every padding path:
    # batch 500 -> 512 (2-step grid), D 100 -> 128, H 96 -> 128, C 10 -> 128.
    batch, input_size, hidden_size, num_classes = 500, 100, 96, 10

    key = jax.random.PRNGKey(0)
    kx, kp = jax.random.split(key)
    x = jax.random.normal(kx, (batch, input_size), jnp.float32)
    w1, b1, w2, b2 = init_params(kp, input_size, hidden_size, num_classes)

    ref = mlp_reference(x, w1, b1, w2, b2)

    # Exact f32 path (module semantics, f32 MXU operands). Tolerance tightened
    # from 2e-2 per review; Mosaic f32 matmuls are full-precision.
    fwd_f32 = make_simple_general_neural_net(w1, b1, w2, b2, matmul_dtype=None)
    out_f32 = jax.block_until_ready(fwd_f32(x))
    assert out_f32.shape == (batch, num_classes)
    assert jnp.allclose(out_f32, ref, atol=1e-4, rtol=1e-4), \
        float(jnp.max(jnp.abs(out_f32 - ref)))

    # Default bf16-MXU-operand path (f32 accumulate, f32 bias/ReLU) — looser tol.
    fwd_bf16 = make_simple_general_neural_net(w1, b1, w2, b2)
    out_bf16 = jax.block_until_ready(fwd_bf16(x))
    assert out_bf16.shape == (batch, num_classes)
    assert jnp.allclose(out_bf16, ref, atol=5e-2, rtol=5e-2), \
        float(jnp.max(jnp.abs(out_bf16 - ref)))

    print("KERNEL_OK")
</pallas_src>

<mosaic_0001>
module attributes {stable_mosaic.version = 11 : i64} {
  func.func @_mlp_kernel(%arg0: i32, %arg1: memref<256x128xf32, #tpu.memory_space<vmem>>, %arg2: memref<128x128xf32, #tpu.memory_space<vmem>>, %arg3: memref<1x128xf32, #tpu.memory_space<vmem>>, %arg4: memref<128x128xf32, #tpu.memory_space<vmem>>, %arg5: memref<1x128xf32, #tpu.memory_space<vmem>>, %arg6: memref<256x128xf32, #tpu.memory_space<vmem>>) attributes {dimension_semantics = [#tpu.dimension_semantics<parallel>], iteration_bounds = array<i64: 2>, scalar_prefetch = 0 : i64, scratch_operands = 0 : i64, tpu.core_type = #tpu.core_type<tc>, window_params = [{transform_indices = @transform_0, window_bounds = array<i64: 256, 128>}, {pipeline_mode = #tpu.pipeline_mode<synchronous>, transform_indices = @transform_1, window_bounds = array<i64: 128, 128>}, {pipeline_mode = #tpu.pipeline_mode<synchronous>, transform_indices = @transform_2, window_bounds = array<i64: 1, 128>}, {pipeline_mode = #tpu.pipeline_mode<synchronous>, transform_indices = @transform_3, window_bounds = array<i64: 128, 128>}, {pipeline_mode = #tpu.pipeline_mode<synchronous>, transform_indices = @transform_4, window_bounds = array<i64: 1, 128>}, {transform_indices = @transform_5, window_bounds = array<i64: 256, 128>}]} {
    %c0 = arith.constant 0 : index
    %c0_0 = arith.constant 0 : index
    %0 = vector.load %arg1[%c0, %c0_0] : memref<256x128xf32, #tpu.memory_space<vmem>>, vector<256x128xf32>
    %c0_1 = arith.constant 0 : index
    %c0_2 = arith.constant 0 : index
    %1 = vector.load %arg2[%c0_1, %c0_2] : memref<128x128xf32, #tpu.memory_space<vmem>>, vector<128x128xf32>
    %cst = arith.constant dense<0.000000e+00> : vector<256x128xf32>
    %2 = tpu.matmul %0, %1, %cst {dimension_numbers = #tpu.dot_dimension_numbers<[1], [0], [0], [1], [0, 0, 1, 1], [], []>} : vector<256x128xf32>, vector<128x128xf32>, vector<256x128xf32> -> vector<256x128xf32>
    %c0_3 = arith.constant 0 : index
    %c0_4 = arith.constant 0 : index
    %3 = vector.load %arg3[%c0_3, %c0_4] : memref<1x128xf32, #tpu.memory_space<vmem>>, vector<1x128xf32>
    %4 = vector.broadcast %3 : vector<1x128xf32> to vector<256x128xf32>
    %5 = arith.addf %2, %4 : vector<256x128xf32>
    %cst_5 = arith.constant 0.000000e+00 : f32
    %6 = vector.broadcast %cst_5 : f32 to vector<256x128xf32>
    %7 = arith.maximumf %5, %6 : vector<256x128xf32>
    %c0_6 = arith.constant 0 : index
    %c0_7 = arith.constant 0 : index
    %8 = vector.load %arg4[%c0_6, %c0_7] : memref<128x128xf32, #tpu.memory_space<vmem>>, vector<128x128xf32>
    %cst_8 = arith.constant dense<0.000000e+00> : vector<256x128xf32>
    %9 = tpu.matmul %7, %8, %cst_8 {dimension_numbers = #tpu.dot_dimension_numbers<[1], [0], [0], [1], [0, 0, 1, 1], [], []>} : vector<256x128xf32>, vector<128x128xf32>, vector<256x128xf32> -> vector<256x128xf32>
    %c0_9 = arith.constant 0 : index
    %c0_10 = arith.constant 0 : index
    %10 = vector.load %arg5[%c0_9, %c0_10] : memref<1x128xf32, #tpu.memory_space<vmem>>, vector<1x128xf32>
    %11 = vector.broadcast %10 : vector<1x128xf32> to vector<256x128xf32>
    %12 = arith.addf %9, %11 : vector<256x128xf32>
    %c0_11 = arith.constant 0 : index
    %c0_12 = arith.constant 0 : index
    %13 = vector.load %arg6[%c0_11, %c0_12] : memref<256x128xf32, #tpu.memory_space<vmem>>, vector<256x128xf32>
    tpu.vector_store %arg6[%c0_11, %c0_12], %12 {strides = array<i32>} : memref<256x128xf32, #tpu.memory_space<vmem>>, vector<256x128xf32>,
    return
  }
  func.func @transform_0(%arg0: i32) -> (i32, i32) {
    %c0_i32 = arith.constant 0 : i32
    %c0_i32_0 = arith.constant 0 : i32
    return %arg0, %c0_i32 : i32, i32
  }
  func.func @transform_1(%arg0: i32) -> (i32, i32) {
    %c0_i32 = arith.constant 0 : i32
    %c0_i32_0 = arith.constant 0 : i32
    %c0_i32_1 = arith.constant 0 : i32
    return %c0_i32, %c0_i32_0 : i32, i32
  }
  func.func @transform_2(%arg0: i32) -> (i32, i32) {
    %c0_i32 = arith.constant 0 : i32
    %c0_i32_0 = arith.constant 0 : i32
    %c0_i32_1 = arith.constant 0 : i32
    return %c0_i32, %c0_i32_0 : i32, i32
  }
  func.func @transform_3(%arg0: i32) -> (i32, i32) {
    %c0_i32 = arith.constant 0 : i32
    %c0_i32_0 = arith.constant 0 : i32
    %c0_i32_1 = arith.constant 0 : i32
    return %c0_i32, %c0_i32_0 : i32, i32
  }
  func.func @transform_4(%arg0: i32) -> (i32, i32) {
    %c0_i32 = arith.constant 0 : i32
    %c0_i32_0 = arith.constant 0 : i32
    %c0_i32_1 = arith.constant 0 : i32
    return %c0_i32, %c0_i32_0 : i32, i32
  }
  func.func @transform_5(%arg0: i32) -> (i32, i32) {
    %c0_i32 = arith.constant 0 : i32
    %c0_i32_0 = arith.constant 0 : i32
    return %arg0, %c0_i32 : i32, i32
  }
}

</mosaic_0001>

<bundles_post_ra>
// kernel: forward.1
= control target key start
LH: loop header
LB: loop body
LE: loop exit
PB: predicated region body
PF: predicated region fallthrough
CT: control target
= control target key end

     0   :  { %s1191_s18 = smov 0   ;;  %s1453_s0 = inlined_call_operand.vmem [shape: f32[512,128], index: 0, kind: input, shape index: {}]   ;;  %s1454_s1 = inlined_call_operand.vmem [shape: f32[128,128], index: 1, kind: input, shape index: {}]   ;;  %s1455_s2 = inlined_call_operand.vmem [shape: f32[1,128], index: 2, kind: input, shape index: {}]   ;;  %s1456_s3 = inlined_call_operand.vmem [shape: f32[128,128], index: 3, kind: input, shape index: {}]   ;;  %s1457_s4 = inlined_call_operand.vmem [shape: f32[1,128], index: 4, kind: input, shape index: {}]   ;;  %s1458_s5 = inlined_call_operand.vmem [shape: f32[512,128], index: 5, kind: output, shape index: {}]  }
   0x1 LB: > { %s876_s19 = sadd.s32 4294967295, %s1159_s18   ;;  %p880_p0 = scmp.ge.s32.totalorder %s1159_s18, 1  ;;  %s1159_s18 = sphi %s1191_s18, %s15_s18  }
   0x2   : > { %p188_p1 = scmp.lt.s32.totalorder %s1159_s18, 3 }
   0x4   : > { %p189_p2 = pnand %p880_p0, %p188_p1 }
   0x5   : > { %s881_s24 = sshll.u32 (!%p189_p2), %s876_s19, 5 }
   0x6   : > { %192 = sbr.rel (%p189_p2) target bundleno = 502 (0x1f6), region = 40  ;;  %p217_p3 = scmp.lt.s32.totalorder (!%p189_p2), %s881_s24, 63 }
   0xb   : > { %v275_v0 = vld [vmem:[%s1454_s1 + $0x78] sm:$0xff]  ;;  %v274_v1 = vld [vmem:[%s1454_s1 + $0x70] sm:$0xff]  ;;  %v273_v2 = vld [vmem:[%s1454_s1 + $0x68] sm:$0xff]  ;;  %s1460_s24 = smov (!%p217_p3, %s881_s24), 63 }
   0xc   : > { %985 = vmatprep.subr.mxu0 %v275_v0  ;;  %v272_v3 = vld [vmem:[%s1454_s1 + $0x60] sm:$0xff]  ;;  %s882_s29 = sshll.u32 %s1460_s24, 3  ;;  %v555_v4 = vld [vmem:[%s1456_s3 + $0x78] sm:$0xff]  ;;  %v554_v6 = vld [vmem:[%s1456_s3 + $0x70] sm:$0xff] }
   0xd   : > { %986 = vmatpush3.msra.mxu0 %v275_v0  ;;  %v271_v5 = vld [vmem:[%s1454_s1 + $0x58] sm:$0xff]  ;;  %s1225_s11 = scalar_lea.vmem %s1453_s0, %s882_s29  ;;  %1065 = vmatprep.subr.mxu1 %v555_v4  ;;  %v270_v8 = vld [vmem:[%s1454_s1 + $0x50] sm:$0xff]  ;;  %v553_v9 = vld [vmem:[%s1456_s3 + $0x68] sm:$0xff]  ;;  %s1384_s30 = scalar_lea.vmem %s1458_s5, %s882_s29 }
   0xe   : > { %987 = vmatprep.subr.mxu0 %v274_v1  ;;  %v228_v7 = vld [vmem:[%s1225_s11] sm:$0xff]  ;;  %1066 = vmatpush3.msra.mxu1 %v555_v4  ;;  %v269_v10 = vld [vmem:[%s1454_s1 + $0x48] sm:$0xff]  ;;  %v551_v13 = vld [vmem:[%s1456_s3 + $0x58] sm:$0xff] }
   0xf   : > { %988 = vmatpush3.msra.mxu0 %v274_v1  ;;  %1017 = vmatprep.mubr.f32.mxu0 %v228_v7  ;;  %v552_v11 = vld [vmem:[%s1456_s3 + $0x60] sm:$0xff]  ;;  %v267_v14 = vld [vmem:[%s1454_s1 + $0x38] sm:$0xff]  ;;  %v266_v15 = vld [vmem:[%s1454_s1 + $0x30] sm:$0xff] }
  0x10   : > { %989 = vmatprep.subr.mxu0 %v273_v2  ;;  %1067 = vmatprep.subr.mxu1 %v554_v6  ;;  %v268_v12 = vld [vmem:[%s1454_s1 + $0x40] sm:$0xff]  ;;  %v550_v16 = vld [vmem:[%s1456_s3 + $0x50] sm:$0xff]  ;;  %v265_v17 = vld [vmem:[%s1454_s1 + $0x28] sm:$0xff] }
  0x11   : > { %990 = vmatpush3.msra.mxu0 %v273_v2  ;;  %1068 = vmatpush3.msra.mxu1 %v554_v6  ;;  %v549_v18 = vld [vmem:[%s1456_s3 + $0x48] sm:$0xff]  ;;  %v548_v19 = vld [vmem:[%s1456_s3 + $0x40] sm:$0xff]  ;;  %v547_v21 = vld [vmem:[%s1456_s3 + $0x38] sm:$0xff] }
  0x12   : > { %991 = vmatprep.subr.mxu0 %v272_v3  ;;  %1069 = vmatprep.subr.mxu1 %v553_v9  ;;  %v264_v20 = vld [vmem:[%s1454_s1 + $0x20] sm:$0xff]  ;;  %v263_v22 = vld [vmem:[%s1454_s1 + $0x18] sm:$0xff]  ;;  %v546_v23 = vld [vmem:[%s1456_s3 + $0x30] sm:$0xff] }
  0x13   : > { %992 = vmatpush3.msra.mxu0 %v272_v3  ;;  %1070 = vmatpush3.msra.mxu1 %v553_v9  ;;  %v262_v24 = vld [vmem:[%s1454_s1 + $0x10] sm:$0xff]  ;;  %v545_v25 = vld [vmem:[%s1456_s3 + $0x28] sm:$0xff]  ;;  %v544_v27 = vld [vmem:[%s1456_s3 + $0x20] sm:$0xff] }
  0x14   : > { %993 = vmatprep.subr.mxu0 %v271_v5  ;;  %1071 = vmatprep.subr.mxu1 %v552_v11  ;;  %v261_v26 = vld [vmem:[%s1454_s1 + $0x8] sm:$0xff]  ;;  %v260_v28 = vld [vmem:[%s1454_s1] sm:$0xff]  ;;  %v230_v30 = vld [vmem:[%s1225_s11 + $0x10] sm:$0xff] }
  0x15   : > { %994 = vmatpush3.msra.mxu0 %v271_v5  ;;  %1072 = vmatpush3.msra.mxu1 %v552_v11  ;;  %v229_v29 = vld [vmem:[%s1225_s11 + $0x8] sm:$0xff]  ;;  %v231_v31 = vld [vmem:[%s1225_s11 + $0x18] sm:$0xff]  ;;  %v232_v32 = vld [vmem:[%s1225_s11 + $0x20] sm:$0xff] }
  0x16   : > { %995 = vmatprep.subr.mxu0 %v270_v8  ;;  %1073 = vmatprep.subr.mxu1 %v551_v13  ;;  %v233_v33 = vld [vmem:[%s1225_s11 + $0x28] sm:$0xff]  ;;  %v234_v34 = vld [vmem:[%s1225_s11 + $0x30] sm:$0xff]  ;;  %v235_v35 = vld [vmem:[%s1225_s11 + $0x38] sm:$0xff] }
  0x17   : > { %996 = vmatpush3.msra.mxu0 %v270_v8  ;;  %1074 = vmatpush3.msra.mxu1 %v551_v13  ;;  %v236_v36 = vld [vmem:[%s1225_s11 + $0x40] sm:$0xff]  ;;  %v237_v37 = vld [vmem:[%s1225_s11 + $0x48] sm:$0xff]  ;;  %v238_v38 = vld [vmem:[%s1225_s11 + $0x50] sm:$0xff] }
  0x18   : > { %997 = vmatprep.subr.mxu0 %v269_v10  ;;  %1075 = vmatprep.subr.mxu1 %v550_v16  ;;  %v239_v39 = vld [vmem:[%s1225_s11 + $0x58] sm:$0xff]  ;;  %v240_v40 = vld [vmem:[%s1225_s11 + $0x60] sm:$0xff]  ;;  %v241_v41 = vld [vmem:[%s1225_s11 + $0x68] sm:$0xff] }
  0x19   : > { %998 = vmatpush3.msra.mxu0 %v269_v10  ;;  %1076 = vmatpush3.msra.mxu1 %v550_v16  ;;  %v242_v42 = vld [vmem:[%s1225_s11 + $0x70] sm:$0xff]  ;;  %v243_v43 = vld [vmem:[%s1225_s11 + $0x78] sm:$0xff]  ;;  %v244_v44 = vld [vmem:[%s1225_s11 + $0x80] sm:$0xff] }
  0x1a   : > { %999 = vmatprep.subr.mxu0 %v268_v12  ;;  %1077 = vmatprep.subr.mxu1 %v549_v18  ;;  %v245_v45 = vld [vmem:[%s1225_s11 + $0x88] sm:$0xff]  ;;  %v246_v46 = vld [vmem:[%s1225_s11 + $0x90] sm:$0xff]  ;;  %v247_v47 = vld [vmem:[%s1225_s11 + $0x98] sm:$0xff] }
  0x1b   : > { %1000 = vmatpush3.msra.mxu0 %v268_v12  ;;  %1078 = vmatpush3.msra.mxu1 %v549_v18  ;;  %v248_v48 = vld [vmem:[%s1225_s11 + $0xa0] sm:$0xff]  ;;  %v249_v49 = vld [vmem:[%s1225_s11 + $0xa8] sm:$0xff]  ;;  %v250_v50 = vld [vmem:[%s1225_s11 + $0xb0] sm:$0xff] }
  0x1c   : > { %1001 = vmatprep.subr.mxu0 %v267_v14  ;;  %1079 = vmatprep.subr.mxu1 %v548_v19  ;;  %v251_v51 = vld [vmem:[%s1225_s11 + $0xb8] sm:$0xff]  ;;  %v252_v52 = vld [vmem:[%s1225_s11 + $0xc0] sm:$0xff]  ;;  %v253_v53 = vld [vmem:[%s1225_s11 + $0xc8] sm:$0xff] }
  0x1d   : > { %1002 = vmatpush3.msra.mxu0 %v267_v14  ;;  %1080 = vmatpush3.msra.mxu1 %v548_v19  ;;  %v254_v54 = vld [vmem:[%s1225_s11 + $0xd0] sm:$0xff]  ;;  %v255_v55 = vld [vmem:[%s1225_s11 + $0xd8] sm:$0xff]  ;;  %v256_v56 = vld [vmem:[%s1225_s11 + $0xe0] sm:$0xff] }
  0x1e   : > { %1003 = vmatprep.subr.mxu0 %v266_v15  ;;  %1081 = vmatprep.subr.mxu1 %v547_v21  ;;  %v257_v57 = vld [vmem:[%s1225_s11 + $0xe8] sm:$0xff]  ;;  %v258_v58 = vld [vmem:[%s1225_s11 + $0xf0] sm:$0xff]  ;;  %v259_v59 = vld [vmem:[%s1225_s11 + $0xf8] sm:$0xff] }
  0x1f   : > { %1004 = vmatpush3.msra.mxu0 %v266_v15  ;;  %1082 = vmatpush3.msra.mxu1 %v547_v21  ;;  %v543_v60 = vld [vmem:[%s1456_s3 + $0x18] sm:$0xff]  ;;  %v542_v61 = vld [vmem:[%s1456_s3 + $0x10] sm:$0xff]  ;;  %v541_v62 = vld [vmem:[%s1456_s3 + $0x8] sm:$0xff] }
  0x20   : > { %1005 = vmatprep.subr.mxu0 %v265_v17  ;;  %1083 = vmatprep.subr.mxu1 %v546_v23  ;;  %v540_v63 = vld [vmem:[%s1456_s3] sm:$0xff] }
  0x21   : > { %1006 = vmatpush3.msra.mxu0 %v265_v17  ;;  %1084 = vmatpush3.msra.mxu1 %v546_v23  ;;  %v1340_v0 = vld [vmem:[%s1455_s2] ss:$0 sm:$0xff] }
  0x22   : > { %1007 = vmatprep.subr.mxu0 %v264_v20  ;;  %1085 = vmatprep.subr.mxu1 %v545_v25 }
  0x23   : > { %1008 = vmatpush3.msra.mxu0 %v264_v20  ;;  %1086 = vmatpush3.msra.mxu1 %v545_v25 }
  0x24   : > { %1009 = vmatprep.subr.mxu0 %v263_v22  ;;  %1087 = vmatprep.subr.mxu1 %v544_v27 }
  0x25   : > { %1010 = vmatpush3.msra.mxu0 %v263_v22  ;;  %1088 = vmatpush3.msra.mxu1 %v544_v27 }
  0x26   : > { %1011 = vmatprep.subr.mxu0 %v262_v24  ;;  %1089 = vmatprep.subr.mxu1 %v543_v60 }
  0x27   : > { %1012 = vmatpush3.msra.mxu0 %v262_v24  ;;  %1090 = vmatpush3.msra.mxu1 %v543_v60 }
  0x28   : > { %1013 = vmatprep.subr.mxu0 %v261_v26  ;;  %1091 = vmatprep.subr.mxu1 %v542_v61 }
  0x29   : > { %1014 = vmatpush3.msra.mxu0 %v261_v26  ;;  %1092 = vmatpush3.msra.mxu1 %v542_v61 }
  0x2a   : > { %1015 = vmatprep.subr.mxu0 %v260_v28  ;;  %1093 = vmatprep.subr.mxu1 %v541_v62 }
  0x2b   : > { %1016 = vmatpush3.msra.mxu0 %v260_v28  ;;  %1094 = vmatpush3.msra.mxu1 %v541_v62 }
  0x2c   : > { %1018 = vmatmul.mubr.f32.vlgmr.msra.gmra.mxu0 %v229_v29  ;;  %1095 = vmatprep.subr.mxu1 %v540_v63 }
  0x2d   : > { %1020 = vmatprep.mubr.f32.mxu0 %v230_v30  ;;  %1096 = vmatpush3.msra.mxu1 %v540_v63 }
  0x30   : > { %1021 = vmatmul.mubr.f32.gmra.mxu0 %v231_v31 }
  0x31   : > { %1023 = vmatprep.mubr.f32.mxu0 %v232_v32 }
  0x34   : > { %1024 = vmatmul.mubr.f32.gmra.mxu0 %v233_v33 }
  0x35   : > { %1026 = vmatprep.mubr.f32.mxu0 %v234_v34 }
  0x38   : > { %1027 = vmatmul.mubr.f32.gmra.mxu0 %v235_v35 }
  0x39   : > { %1029 = vmatprep.mubr.f32.mxu0 %v236_v36 }
  0x3c   : > { %1030 = vmatmul.mubr.f32.gmra.mxu0 %v237_v37 }
  0x3d   : > { %1032 = vmatprep.mubr.f32.mxu0 %v238_v38 }
  0x40   : > { %1033 = vmatmul.mubr.f32.gmra.mxu0 %v239_v39 }
  0x41   : > { %1035 = vmatprep.mubr.f32.mxu0 %v240_v40 }
  0x44   : > { %1036 = vmatmul.mubr.f32.gmra.mxu0 %v241_v41 }
  0x45   : > { %1038 = vmatprep.mubr.f32.mxu0 %v242_v42 }
  0x48   : > { %1039 = vmatmul.mubr.f32.gmra.mxu0 %v243_v43 }
  0x49   : > { %1041 = vmatprep.mubr.f32.mxu0 %v244_v44 }
  0x4c   : > { %1042 = vmatmul.mubr.f32.gmra.mxu0 %v245_v45 }
  0x4d   : > { %1044 = vmatprep.mubr.f32.mxu0 %v246_v46 }
  0x50   : > { %1045 = vmatmul.mubr.f32.gmra.mxu0 %v247_v47 }
  0x51   : > { %1047 = vmatprep.mubr.f32.mxu0 %v248_v48 }
  0x54   : > { %1048 = vmatmul.mubr.f32.gmra.mxu0 %v249_v49 }
  0x55   : > { %1050 = vmatprep.mubr.f32.mxu0 %v250_v50 }
  0x58   : > { %1051 = vmatmul.mubr.f32.gmra.mxu0 %v251_v51 }
  0x59   : > { %1053 = vmatprep.mubr.f32.mxu0 %v252_v52 }
  0x5c   : > { %1054 = vmatmul.mubr.f32.gmra.mxu0 %v253_v53 }
  0x5d   : > { %1056 = vmatprep.mubr.f32.mxu0 %v254_v54 }
  0x60   : > { %1057 = vmatmul.mubr.f32.gmra.mxu0 %v255_v55 }
  0x61   : > { %1059 = vmatprep.mubr.f32.mxu0 %v256_v56 }
  0x64   : > { %1060 = vmatmul.mubr.f32.gmra.mxu0 %v257_v57 }
  0x65   : > { %1062 = vmatprep.mubr.f32.mxu0 %v258_v58 }
  0x68   : > { %1063 = vmatmul.mubr.f32.gmra.mxu0 %v259_v59 }
  0xec   : > { %v1019_v1 = vpop.f32.mrf.mxu0 }
  0xed   : > { %v355_v2 = vadd.f32 %v1019_v1, %v1340_v0 }
  0xee   : > { %v349_v3 = vpop.f32.mrf.mxu0 }
  0xef   : > { %v350_v4 = vadd.f32 %v1340_v0, %v349_v3  ;;  %v509_v7 = vmax.f32 %v355_v2, 0.0 }
  0xf0   : > { %v1022_v5 = vpop.f32.mrf.mxu0 }
  0xf1   : > { %v508_v6 = vmax.f32 %v350_v4, 0.0  ;;  %v365_v8 = vadd.f32 %v1022_v5, %v1340_v0 }
  0xf2   : > { %v359_v9 = vpop.f32.mrf.mxu0 }
  0xf3   : > { %v360_v10 = vadd.f32 %v1340_v0, %v359_v9  ;;  %1097 = vmatprep.mubr.f32.mxu1 %v508_v6  ;;  %v511_v13 = vmax.f32 %v365_v8, 0.0 }
  0xf4   : > { %v1025_v11 = vpop.f32.mrf.mxu0  ;;  %1098 = vmatmul.mubr.f32.vlgmr.msra.gmra.mxu1 %v509_v7 }
  0xf5   : > { %v510_v12 = vmax.f32 %v360_v10, 0.0  ;;  %v375_v14 = vadd.f32 %v1025_v11, %v1340_v0 }
  0xf6   : > { %v369_v15 = vpop.f32.mrf.mxu0 }
  0xf7   : > { %v370_v16 = vadd.f32 %v1340_v0, %v369_v15  ;;  %1100 = vmatprep.mubr.f32.mxu1 %v510_v12  ;;  %v513_v19 = vmax.f32 %v375_v14, 0.0 }
  0xf8   : > { %v1028_v17 = vpop.f32.mrf.mxu0  ;;  %1101 = vmatmul.mubr.f32.gmra.mxu1 %v511_v13 }
  0xf9   : > { %v512_v18 = vmax.f32 %v370_v16, 0.0  ;;  %v385_v20 = vadd.f32 %v1028_v17, %v1340_v0 }
  0xfa   : > { %v379_v21 = vpop.f32.mrf.mxu0 }
  0xfb   : > { %v380_v22 = vadd.f32 %v1340_v0, %v379_v21  ;;  %1103 = vmatprep.mubr.f32.mxu1 %v512_v18  ;;  %v515_v25 = vmax.f32 %v385_v20, 0.0 }
  0xfc   : > { %v1031_v23 = vpop.f32.mrf.mxu0  ;;  %1104 = vmatmul.mubr.f32.gmra.mxu1 %v513_v19 }
  0xfd   : > { %v514_v24 = vmax.f32 %v380_v22, 0.0  ;;  %v395_v26 = vadd.f32 %v1031_v23, %v1340_v0 }
  0xfe   : > { %v389_v27 = vpop.f32.mrf.mxu0 }
  0xff   : > { %v390_v28 = vadd.f32 %v1340_v0, %v389_v27  ;;  %1106 = vmatprep.mubr.f32.mxu1 %v514_v24  ;;  %v517_v31 = vmax.f32 %v395_v26, 0.0 }
 0x100   : > { %v1034_v29 = vpop.f32.mrf.mxu0  ;;  %1107 = vmatmul.mubr.f32.gmra.mxu1 %v515_v25 }
 0x101   : > { %v516_v30 = vmax.f32 %v390_v28, 0.0  ;;  %v405_v32 = vadd.f32 %v1034_v29, %v1340_v0 }
 0x102   : > { %v399_v33 = vpop.f32.mrf.mxu0 }
 0x103   : > { %v400_v34 = vadd.f32 %v1340_v0, %v399_v33  ;;  %1109 = vmatprep.mubr.f32.mxu1 %v516_v30  ;;  %v519_v37 = vmax.f32 %v405_v32, 0.0 }
 0x104   : > { %v1037_v35 = vpop.f32.mrf.mxu0  ;;  %1110 = vmatmul.mubr.f32.gmra.mxu1 %v517_v31 }
 0x105   : > { %v518_v36 = vmax.f32 %v400_v34, 0.0  ;;  %v415_v38 = vadd.f32 %v1037_v35, %v1340_v0  ;;  %v1377_v34 = vld [vmem:[%s1457_s4] ss:$0 sm:$0xff] }
 0x106   : > { %v409_v39 = vpop.f32.mrf.mxu0 }
 0x107   : > { %v410_v40 = vadd.f32 %v1340_v0, %v409_v39  ;;  %1112 = vmatprep.mubr.f32.mxu1 %v518_v36  ;;  %v521_v43 = vmax.f32 %v415_v38, 0.0 }
 0x108   : > { %v1040_v41 = vpop.f32.mrf.mxu0  ;;  %1113 = vmatmul.mubr.f32.gmra.mxu1 %v519_v37 }
 0x109   : > { %v520_v42 = vmax.f32 %v410_v40, 0.0  ;;  %v425_v44 = vadd.f32 %v1040_v41, %v1340_v0 }
 0x10a   : > { %v419_v45 = vpop.f32.mrf.mxu0 }
 0x10b   : > { %v420_v46 = vadd.f32 %v1340_v0, %v419_v45  ;;  %1115 = vmatprep.mubr.f32.mxu1 %v520_v42  ;;  %v523_v49 = vmax.f32 %v425_v44, 0.0 }
 0x10c   : > { %v1043_v47 = vpop.f32.mrf.mxu0  ;;  %1116 = vmatmul.mubr.f32.gmra.mxu1 %v521_v43 }
 0x10d   : > { %v522_v48 = vmax.f32 %v420_v46, 0.0  ;;  %v435_v50 = vadd.f32 %v1043_v47, %v1340_v0 }
 0x10e   : > { %v429_v51 = vpop.f32.mrf.mxu0 }
 0x10f   : > { %v430_v52 = vadd.f32 %v1340_v0, %v429_v51  ;;  %1118 = vmatprep.mubr.f32.mxu1 %v522_v48  ;;  %v525_v55 = vmax.f32 %v435_v50, 0.0 }
 0x110   : > { %v1046_v53 = vpop.f32.mrf.mxu0  ;;  %1119 = vmatmul.mubr.f32.gmra.mxu1 %v523_v49 }
 0x111   : > { %v524_v54 = vmax.f32 %v430_v52, 0.0  ;;  %v445_v56 = vadd.f32 %v1046_v53, %v1340_v0 }
 0x112   : > { %v439_v57 = vpop.f32.mrf.mxu0 }
 0x113   : > { %v440_v58 = vadd.f32 %v1340_v0, %v439_v57  ;;  %1121 = vmatprep.mubr.f32.mxu1 %v524_v54  ;;  %v527_v61 = vmax.f32 %v445_v56, 0.0 }
 0x114   : > { %v1049_v59 = vpop.f32.mrf.mxu0  ;;  %1122 = vmatmul.mubr.f32.gmra.mxu1 %v525_v55 }
 0x115   : > { %v526_v60 = vmax.f32 %v440_v58, 0.0  ;;  %v455_v62 = vadd.f32 %v1049_v59, %v1340_v0 }
 0x116   : > { %v449_v63 = vpop.f32.mrf.mxu0 }
 0x117   : > { %v450_v1 = vadd.f32 %v1340_v0, %v449_v63  ;;  %1124 = vmatprep.mubr.f32.mxu1 %v526_v60  ;;  %v529_v4 = vmax.f32 %v455_v62, 0.0 }
 0x118   : > { %v1052_v2 = vpop.f32.mrf.mxu0  ;;  %1125 = vmatmul.mubr.f32.gmra.mxu1 %v527_v61 }
 0x119   : > { %v528_v3 = vmax.f32 %v450_v1, 0.0  ;;  %v465_v5 = vadd.f32 %v1052_v2, %v1340_v0 }
 0x11a   : > { %v459_v6 = vpop.f32.mrf.mxu0 }
 0x11b   : > { %v460_v7 = vadd.f32 %v1340_v0, %v459_v6  ;;  %1127 = vmatprep.mubr.f32.mxu1 %v528_v3  ;;  %v531_v10 = vmax.f32 %v465_v5, 0.0 }
 0x11c   : > { %v1055_v8 = vpop.f32.mrf.mxu0  ;;  %1128 = vmatmul.mubr.f32.gmra.mxu1 %v529_v4 }
 0x11d   : > { %v530_v9 = vmax.f32 %v460_v7, 0.0  ;;  %v475_v11 = vadd.f32 %v1055_v8, %v1340_v0 }
 0x11e   : > { %v469_v12 = vpop.f32.mrf.mxu0 }
 0x11f   : > { %v470_v13 = vadd.f32 %v1340_v0, %v469_v12  ;;  %1130 = vmatprep.mubr.f32.mxu1 %v530_v9  ;;  %v533_v16 = vmax.f32 %v475_v11, 0.0 }
 0x120   : > { %v1058_v14 = vpop.f32.mrf.mxu0  ;;  %1131 = vmatmul.mubr.f32.gmra.mxu1 %v531_v10 }
 0x121   : > { %v532_v15 = vmax.f32 %v470_v13, 0.0  ;;  %v485_v17 = vadd.f32 %v1058_v14, %v1340_v0 }
 0x122   : > { %v479_v18 = vpop.f32.mrf.mxu0 }
 0x123   : > { %v480_v19 = vadd.f32 %v1340_v0, %v479_v18  ;;  %1133 = vmatprep.mubr.f32.mxu1 %v532_v15  ;;  %v535_v22 = vmax.f32 %v485_v17, 0.0 }
 0x124   : > { %v1061_v20 = vpop.f32.mrf.mxu0  ;;  %1134 = vmatmul.mubr.f32.gmra.mxu1 %v533_v16 }
 0x125   : > { %v534_v21 = vmax.f32 %v480_v19, 0.0  ;;  %v495_v23 = vadd.f32 %v1061_v20, %v1340_v0 }
 0x126   : > { %v489_v24 = vpop.f32.mrf.mxu0 }
 0x127   : > { %v490_v25 = vadd.f32 %v1340_v0, %v489_v24  ;;  %1136 = vmatprep.mubr.f32.mxu1 %v534_v21  ;;  %v537_v28 = vmax.f32 %v495_v23, 0.0 }
 0x128   : > { %v1064_v26 = vpop.f32.mrf.mxu0  ;;  %1137 = vmatmul.mubr.f32.gmra.mxu1 %v535_v22 }
 0x129   : > { %v536_v27 = vmax.f32 %v490_v25, 0.0  ;;  %v505_v29 = vadd.f32 %v1064_v26, %v1340_v0 }
 0x12a   : > { %v499_v30 = vpop.f32.mrf.mxu0 }
 0x12b   : > { %v500_v31 = vadd.f32 %v1340_v0, %v499_v30  ;;  %1139 = vmatprep.mubr.f32.mxu1 %v536_v27  ;;  %v539_v33 = vmax.f32 %v505_v29, 0.0 }
 0x12c   : > { %1140 = vmatmul.mubr.f32.gmra.mxu1 %v537_v28 }
 0x12d   : > { %v538_v32 = vmax.f32 %v500_v31, 0.0 }
 0x12f   : > { %1142 = vmatprep.mubr.f32.mxu1 %v538_v32 }
 0x130   : > { %1143 = vmatmul.mubr.f32.gmra.mxu1 %v539_v33 }
 0x1b4   : > { %v1099_v0 = vpop.f32.mrf.mxu1 }
 0x1b5   : > { %v635_v35 = vadd.f32 %v1099_v0, %v1377_v34 }
 0x1b6   : > { %v629_v36 = vpop.f32.mrf.mxu1 }
 0x1b7   : > { %789 = vst [vmem:[%s1384_s30 + $0x8] sm:$0xff] %v635_v35  ;;  %v630_v37 = vadd.f32 %v1377_v34, %v629_v36 }
 0x1b8   : > { %v1102_v38 = vpop.f32.mrf.mxu1 }
 0x1b9   : > { %788 = vst [vmem:[%s1384_s30] sm:$0xff] %v630_v37  ;;  %v645_v39 = vadd.f32 %v1102_v38, %v1377_v34 }
 0x1ba   : > { %v639_v40 = vpop.f32.mrf.mxu1 }
 0x1bb   : > { %791 = vst [vmem:[%s1384_s30 + $0x18] sm:$0xff] %v645_v39  ;;  %v640_v41 = vadd.f32 %v1377_v34, %v639_v40 }
 0x1bc   : > { %v1105_v42 = vpop.f32.mrf.mxu1 }
 0x1bd   : > { %790 = vst [vmem:[%s1384_s30 + $0x10] sm:$0xff] %v640_v41  ;;  %v655_v43 = vadd.f32 %v1105_v42, %v1377_v34 }
 0x1be   : > { %v649_v44 = vpop.f32.mrf.mxu1 }
 0x1bf   : > { %793 = vst [vmem:[%s1384_s30 + $0x28] sm:$0xff] %v655_v43  ;;  %v650_v45 = vadd.f32 %v1377_v34, %v649_v44 }
 0x1c0   : > { %v1108_v46 = vpop.f32.mrf.mxu1 }
 0x1c1   : > { %792 = vst [vmem:[%s1384_s30 + $0x20] sm:$0xff] %v650_v45  ;;  %v665_v47 = vadd.f32 %v1108_v46, %v1377_v34 }
 0x1c2   : > { %v659_v48 = vpop.f32.mrf.mxu1 }
 0x1c3   : > { %795 = vst [vmem:[%s1384_s30 + $0x38] sm:$0xff] %v665_v47  ;;  %v660_v49 = vadd.f32 %v1377_v34, %v659_v48 }
 0x1c4   : > { %v1111_v50 = vpop.f32.mrf.mxu1 }
 0x1c5   : > { %794 = vst [vmem:[%s1384_s30 + $0x30] sm:$0xff] %v660_v49  ;;  %v675_v51 = vadd.f32 %v1111_v50, %v1377_v34 }
 0x1c6   : > { %v669_v52 = vpop.f32.mrf.mxu1 }
 0x1c7   : > { %797 = vst [vmem:[%s1384_s30 + $0x48] sm:$0xff] %v675_v51  ;;  %v670_v53 = vadd.f32 %v1377_v34, %v669_v52 }
 0x1c8   : > { %v1114_v54 = vpop.f32.mrf.mxu1 }
 0x1c9   : > { %796 = vst [vmem:[%s1384_s30 + $0x40] sm:$0xff] %v670_v53  ;;  %v685_v55 = vadd.f32 %v1114_v54, %v1377_v34 }
 0x1ca   : > { %v679_v56 = vpop.f32.mrf.mxu1 }
 0x1cb   : > { %799 = vst [vmem:[%s1384_s30 + $0x58] sm:$0xff] %v685_v55  ;;  %v680_v57 = vadd.f32 %v1377_v34, %v679_v56 }
 0x1cc   : > { %v1117_v58 = vpop.f32.mrf.mxu1 }
 0x1cd   : > { %798 = vst [vmem:[%s1384_s30 + $0x50] sm:$0xff] %v680_v57  ;;  %v695_v59 = vadd.f32 %v1117_v58, %v1377_v34 }
 0x1ce   : > { %v689_v60 = vpop.f32.mrf.mxu1 }
 0x1cf   : > { %801 = vst [vmem:[%s1384_s30 + $0x68] sm:$0xff] %v695_v59  ;;  %v690_v61 = vadd.f32 %v1377_v34, %v689_v60 }
 0x1d0   : > { %v1120_v62 = vpop.f32.mrf.mxu1 }
 0x1d1   : > { %800 = vst [vmem:[%s1384_s30 + $0x60] sm:$0xff] %v690_v61  ;;  %v705_v63 = vadd.f32 %v1120_v62, %v1377_v34 }
 0x1d2   : > { %v699_v1 = vpop.f32.mrf.mxu1 }
 0x1d3   : > { %803 = vst [vmem:[%s1384_s30 + $0x78] sm:$0xff] %v705_v63  ;;  %v700_v2 = vadd.f32 %v1377_v34, %v699_v1 }
 0x1d4   : > { %v1123_v3 = vpop.f32.mrf.mxu1 }
 0x1d5   : > { %802 = vst [vmem:[%s1384_s30 + $0x70] sm:$0xff] %v700_v2  ;;  %v715_v4 = vadd.f32 %v1123_v3, %v1377_v34 }
 0x1d6   : > { %v709_v5 = vpop.f32.mrf.mxu1 }
 0x1d7   : > { %805 = vst [vmem:[%s1384_s30 + $0x88] sm:$0xff] %v715_v4  ;;  %v710_v6 = vadd.f32 %v1377_v34, %v709_v5 }
 0x1d8   : > { %v1126_v7 = vpop.f32.mrf.mxu1 }
 0x1d9   : > { %804 = vst [vmem:[%s1384_s30 + $0x80] sm:$0xff] %v710_v6  ;;  %v725_v8 = vadd.f32 %v1126_v7, %v1377_v34 }
 0x1da   : > { %v719_v9 = vpop.f32.mrf.mxu1 }
 0x1db   : > { %807 = vst [vmem:[%s1384_s30 + $0x98] sm:$0xff] %v725_v8  ;;  %v720_v10 = vadd.f32 %v1377_v34, %v719_v9 }
 0x1dc   : > { %v1129_v11 = vpop.f32.mrf.mxu1 }
 0x1dd   : > { %806 = vst [vmem:[%s1384_s30 + $0x90] sm:$0xff] %v720_v10  ;;  %v735_v12 = vadd.f32 %v1129_v11, %v1377_v34 }
 0x1de   : > { %v729_v13 = vpop.f32.mrf.mxu1 }
 0x1df   : > { %809 = vst [vmem:[%s1384_s30 + $0xa8] sm:$0xff] %v735_v12  ;;  %v730_v14 = vadd.f32 %v1377_v34, %v729_v13 }
 0x1e0   : > { %v1132_v15 = vpop.f32.mrf.mxu1 }
 0x1e1   : > { %808 = vst [vmem:[%s1384_s30 + $0xa0] sm:$0xff] %v730_v14  ;;  %v745_v16 = vadd.f32 %v1132_v15, %v1377_v34 }
 0x1e2   : > { %v739_v17 = vpop.f32.mrf.mxu1 }
 0x1e3   : > { %811 = vst [vmem:[%s1384_s30 + $0xb8] sm:$0xff] %v745_v16  ;;  %v740_v18 = vadd.f32 %v1377_v34, %v739_v17 }
 0x1e4   : > { %v1135_v19 = vpop.f32.mrf.mxu1 }
 0x1e5   : > { %810 = vst [vmem:[%s1384_s30 + $0xb0] sm:$0xff] %v740_v18  ;;  %v755_v20 = vadd.f32 %v1135_v19, %v1377_v34 }
 0x1e6   : > { %v749_v21 = vpop.f32.mrf.mxu1 }
 0x1e7   : > { %813 = vst [vmem:[%s1384_s30 + $0xc8] sm:$0xff] %v755_v20  ;;  %v750_v22 = vadd.f32 %v1377_v34, %v749_v21 }
 0x1e8   : > { %v1138_v23 = vpop.f32.mrf.mxu1 }
 0x1e9   : > { %812 = vst [vmem:[%s1384_s30 + $0xc0] sm:$0xff] %v750_v22  ;;  %v765_v24 = vadd.f32 %v1138_v23, %v1377_v34 }
 0x1ea   : > { %v759_v25 = vpop.f32.mrf.mxu1 }
 0x1eb   : > { %815 = vst [vmem:[%s1384_s30 + $0xd8] sm:$0xff] %v765_v24  ;;  %v760_v26 = vadd.f32 %v1377_v34, %v759_v25 }
 0x1ec   : > { %v1141_v27 = vpop.f32.mrf.mxu1 }
 0x1ed   : > { %814 = vst [vmem:[%s1384_s30 + $0xd0] sm:$0xff] %v760_v26  ;;  %v775_v28 = vadd.f32 %v1141_v27, %v1377_v34 }
 0x1ee   : > { %v769_v29 = vpop.f32.mrf.mxu1 }
 0x1ef   : > { %817 = vst [vmem:[%s1384_s30 + $0xe8] sm:$0xff] %v775_v28  ;;  %v770_v30 = vadd.f32 %v1377_v34, %v769_v29 }
 0x1f0   : > { %v1144_v31 = vpop.f32.mrf.mxu1 }
 0x1f1   : > { %816 = vst [vmem:[%s1384_s30 + $0xe0] sm:$0xff] %v770_v30  ;;  %v785_v32 = vadd.f32 %v1144_v31, %v1377_v34 }
 0x1f2   : > { %v779_v33 = vpop.f32.mrf.mxu1 }
 0x1f3   : > { %819 = vst [vmem:[%s1384_s30 + $0xf8] sm:$0xff] %v785_v32  ;;  %v780_v0 = vadd.f32 %v1377_v34, %v779_v33 }
 0x1f5   : > { %818 = vst [vmem:[%s1384_s30 + $0xf0] sm:$0xff] %v780_v0 }
 0x1f6 PF: > { %s15_s18 = sadd.s32 1, %s1159_s18  }
 0x1f7   : > { %p12_p4 = scmp.ge.s32.totalorder %s15_s18, 4  }
 0x1f9   :  { %14 = sbr.rel (!%p12_p4) target bundleno = 1 (0x1), region = 70 }

</bundles_post_ra>
